<compile_context>
chip_gen: v7x
topology: tpu7x:2x2x1
jax: 0.10.0
libtpu: 0.0.40
codegen_flags: <defaults>
</compile_context>

<pallas_src>
import functools

import jax
import jax.numpy as jnp
from jax.experimental import pallas as pl
from jax.experimental.pallas import tpu as pltpu


# Lane-dense tiling parameters.
_LANES = 512        # last dim of the flattened slab (multiple of 128)
_BLOCK_ROWS = 1024  # rows per grid step -> 2 MiB f32 blocks (VMEM-safe on v5e/v6e/v7x)


def _scale_kernel(scale_ref, pts_ref, out_ref):
    # pts_ref  : (block_rows, _LANES) lane-dense slab of flattened points.
    # scale_ref: (1, _LANES) per-lane scale (channel pattern tiled across the
    #            lane axis, non-xyz channels = 1.0). Constant index_map keeps
    #            it resident in VMEM across grid steps.
    x = pts_ref[...].astype(jnp.float32) * scale_ref[...]
    out_ref[...] = x.astype(out_ref.dtype)


def _make_scale(key, *, scale_min, scale_max, anisotropic, scale_xyz, symmetries):
    """Reproduces the PyTorch random-scale construction (plain-JAX glue)."""
    k1, k2 = jax.random.split(key)
    n = 3 if anisotropic else 1
    scale = jax.random.uniform(k1, (n,), jnp.float32) * (scale_max - scale_min) + scale_min
    scale = jnp.broadcast_to(scale, (3,))
    # symmetries = round(rand(3)) * 2 - 1  -> random signs in {-1, +1}
    sym_rand = jnp.round(jax.random.uniform(k2, (3,), jnp.float32)) * 2.0 - 1.0
    sym_cfg = jnp.asarray(symmetries, jnp.float32)
    sym = sym_rand * sym_cfg + (1.0 - sym_cfg)
    scale = scale * sym
    # for i, s in enumerate(scale_xyz): if not s: scale[i] = 1
    xyz_mask = jnp.asarray([bool(s) for s in scale_xyz])
    scale = jnp.where(xyz_mask, scale, jnp.float32(1.0))
    return scale


@functools.partial(
    jax.jit,
    static_argnames=("scale_min", "scale_max", "anisotropic", "scale_xyz", "symmetries"),
)
def pointcloud_scaling(
    points,
    key,
    *,
    scale_min=0.8,
    scale_max=1.2,
    anisotropic=True,
    scale_xyz=(True, True, True),
    symmetries=(0, 0, 0),
):
    B, N, C = points.shape
    assert C >= 3, "points must have at least xyz channels"

    scale3 = _make_scale(
        key,
        scale_min=scale_min,
        scale_max=scale_max,
        anisotropic=anisotropic,
        scale_xyz=scale_xyz,
        symmetries=symmetries,
    )
    # Per-channel scale: xyz channels get the random scale, the rest are 1.0.
    scale_c = jnp.concatenate([scale3, jnp.ones((C - 3,), jnp.float32)])  # (C,) f32

    if _LANES % C != 0:
        # TODO(synk): no lane-dense reshape when C does not divide the lane tile;
        # for this rare case the fused XLA broadcast-multiply (already HBM-bound)
        # beats a 3%-lane-utilized Pallas kernel, so fall back to it.
        return (points.astype(jnp.float32) * scale_c).astype(points.dtype)

    # Flatten row-major so each 512-lane row starts at channel 0, pad to a
    # multiple of _LANES with zeros (sliced off afterwards).
    total = B * N * C
    pad = (-total) % _LANES
    flat = points.reshape(total)
    if pad:
        flat = jnp.concatenate([flat, jnp.zeros((pad,), points.dtype)])
    rows = (total + pad) // _LANES
    slab = flat.reshape(rows, _LANES)

    # Row tile: multiple of 8 (f32 sublane) when tiling, or the full dim if small.
    br = min(_BLOCK_ROWS, rows)
    grid = (pl.cdiv(rows, br),)

    # Lane-dense scale vector: channel pattern tiled across the lane axis.
    scale_lane = jnp.tile(scale_c, _LANES // C).reshape(1, _LANES)

    out = pl.pallas_call(
        _scale_kernel,
        out_shape=jax.ShapeDtypeStruct((rows, _LANES), points.dtype),
        grid_spec=pltpu.PrefetchScalarGridSpec(
            num_scalar_prefetch=0,
            grid=grid,
            in_specs=[
                pl.BlockSpec((1, _LANES), lambda i: (0, 0)),   # scale: resident block
                pl.BlockSpec((br, _LANES), lambda i: (i, 0)),  # points row tile
            ],
            out_specs=pl.BlockSpec((br, _LANES), lambda i: (i, 0)),
        ),
        compiler_params=pltpu.CompilerParams(
            dimension_semantics=("parallel",),
        ),
        input_output_aliases={1: 0},  # points slab -> output (in-place transform)
    )(scale_lane, slab)

    out_flat = out.reshape(rows * _LANES)
    if pad:
        out_flat = out_flat[:total]
    return out_flat.reshape(B, N, C)


def _reference(points, key, **kw):
    scale3 = _make_scale(key, **kw)
    return points.at[:, :, :3].set(points[:, :, :3] * scale3)


if __name__ == "__main__":
    key = jax.random.PRNGKey(0)
    k_pts, k_scale = jax.random.split(key)

    cfg = dict(
        scale_min=0.8,
        scale_max=1.2,
        anisotropic=True,
        scale_xyz=(True, True, True),
        symmetries=(0, 0, 0),
    )

    # Small point cloud consistent with the module: 2 clouds, 128 points, xyz + 1 feature.
    B, N, C = 2, 128, 4
    points = jax.random.normal(k_pts, (B, N, C), jnp.float32)

    out = pointcloud_scaling(points, k_scale, **cfg)
    out = jax.block_until_ready(out)
    ref = _reference(points, k_scale, **cfg)
    assert jnp.allclose(out, ref, atol=1e-6), "mismatch vs reference"

    # Second small shape exercising the lane-padding path (N*C not a multiple of 512).
    points2 = jax.random.normal(k_pts, (2, 1000, 4), jnp.float32)
    out2 = jax.block_until_ready(pointcloud_scaling(points2, k_scale, **cfg))
    ref2 = _reference(points2, k_scale, **cfg)
    assert jnp.allclose(out2, ref2, atol=1e-6), "mismatch vs reference (padded path)"

    print("KERNEL_OK")
</pallas_src>

<mosaic_0001>
module attributes {stable_mosaic.version = 11 : i64} {
  func.func @_scale_kernel(%arg0: i32, %arg1: memref<1x512xf32, #tpu.memory_space<vmem>>, %arg2: memref<2x512xf32, #tpu.memory_space<vmem>>, %arg3: memref<2x512xf32, #tpu.memory_space<vmem>>) attributes {dimension_semantics = [#tpu.dimension_semantics<parallel>], iteration_bounds = array<i64: 1>, scalar_prefetch = 0 : i64, scratch_operands = 0 : i64, tpu.core_type = #tpu.core_type<tc>, window_params = [{pipeline_mode = #tpu.pipeline_mode<synchronous>, transform_indices = @transform_0, window_bounds = array<i64: 1, 512>}, {transform_indices = @transform_1, window_bounds = array<i64: 2, 512>}, {transform_indices = @transform_2, window_bounds = array<i64: 2, 512>}]} {
    %c0 = arith.constant 0 : index
    %c0_0 = arith.constant 0 : index
    %0 = vector.load %arg2[%c0, %c0_0] : memref<2x512xf32, #tpu.memory_space<vmem>>, vector<2x512xf32>
    %c0_1 = arith.constant 0 : index
    %c0_2 = arith.constant 0 : index
    %1 = vector.load %arg1[%c0_1, %c0_2] : memref<1x512xf32, #tpu.memory_space<vmem>>, vector<1x512xf32>
    %2 = vector.broadcast %1 : vector<1x512xf32> to vector<2x512xf32>
    %3 = arith.mulf %0, %2 : vector<2x512xf32>
    %c0_3 = arith.constant 0 : index
    %c0_4 = arith.constant 0 : index
    %4 = vector.load %arg3[%c0_3, %c0_4] : memref<2x512xf32, #tpu.memory_space<vmem>>, vector<2x512xf32>
    tpu.vector_store %arg3[%c0_3, %c0_4], %3 {strides = array<i32>} : memref<2x512xf32, #tpu.memory_space<vmem>>, vector<2x512xf32>,
    return
  }
  func.func @transform_0(%arg0: i32) -> (i32, i32) {
    %c0_i32 = arith.constant 0 : i32
    %c0_i32_0 = arith.constant 0 : i32
    %c0_i32_1 = arith.constant 0 : i32
    return %c0_i32, %c0_i32_0 : i32, i32
  }
  func.func @transform_1(%arg0: i32) -> (i32, i32) {
    %c0_i32 = arith.constant 0 : i32
    %c0_i32_0 = arith.constant 0 : i32
    return %arg0, %c0_i32 : i32, i32
  }
  func.func @transform_2(%arg0: i32) -> (i32, i32) {
    %c0_i32 = arith.constant 0 : i32
    %c0_i32_0 = arith.constant 0 : i32
    return %arg0, %c0_i32 : i32, i32
  }
}

</mosaic_0001>

<bundles_post_ra>
// kernel: tile.8
= control target key start
LH: loop header
LB: loop body
LE: loop exit
PB: predicated region body
PF: predicated region fallthrough
CT: control target
= control target key end

     0   :  { %s112_s0 = inlined_call_operand.vmem [shape: f32[4], index: 0, kind: input, shape index: {}]   ;;  %s113_s1 = inlined_call_operand.vmem [shape: f32[128,4], index: 1, kind: output, shape index: {}]  }
   0x1   :  { %v4_v0 = vld [vmem:[%s112_s0] ss:$0 sm:$0xff] }
   0x2   :  { %5 = vst [vmem:[%s113_s1] sm:$0xff] %v4_v0  ;;  %36 = vst [vmem:[%s113_s1 + $0x8] sm:$0xff] %v4_v0 }
   0x3   :  { %37 = vst [vmem:[%s113_s1 + $0x10] sm:$0xff] %v4_v0  ;;  %38 = vst [vmem:[%s113_s1 + $0x18] sm:$0xff] %v4_v0 }
   0x4   :  { %39 = vst [vmem:[%s113_s1 + $0x20] sm:$0xff] %v4_v0  ;;  %40 = vst [vmem:[%s113_s1 + $0x28] sm:$0xff] %v4_v0 }
   0x5   :  { %41 = vst [vmem:[%s113_s1 + $0x30] sm:$0xff] %v4_v0  ;;  %42 = vst [vmem:[%s113_s1 + $0x38] sm:$0xff] %v4_v0 }
   0x6   :  { %43 = vst [vmem:[%s113_s1 + $0x40] sm:$0xff] %v4_v0  ;;  %44 = vst [vmem:[%s113_s1 + $0x48] sm:$0xff] %v4_v0 }
   0x7   :  { %45 = vst [vmem:[%s113_s1 + $0x50] sm:$0xff] %v4_v0  ;;  %46 = vst [vmem:[%s113_s1 + $0x58] sm:$0xff] %v4_v0 }
   0x8   :  { %47 = vst [vmem:[%s113_s1 + $0x60] sm:$0xff] %v4_v0  ;;  %48 = vst [vmem:[%s113_s1 + $0x68] sm:$0xff] %v4_v0 }
   0x9   :  { %49 = vst [vmem:[%s113_s1 + $0x70] sm:$0xff] %v4_v0  ;;  %50 = vst [vmem:[%s113_s1 + $0x78] sm:$0xff] %v4_v0 }

// kernel: tile.9
= control target key start
LH: loop header
LB: loop body
LE: loop exit
PB: predicated region body
PF: predicated region fallthrough
CT: control target
= control target key end

     0   :  { %vm5_vm0 = vcmask 1041409   ;;  %vm9_vm1 = vcmask 1042434   ;;  %vm13_vm2 = vcmask 1043459   ;;  %s761_s30 = smov 124   ;;  %s762_s8 = smov 116   ;;  %vm15_vm3 = vcmask 31744   ;;  %s1295_s0 = inlined_call_operand.vmem [shape: f32[128,4], index: 0, kind: input, shape index: {}]   ;;  %s1296_s1 = inlined_call_operand.vmem [shape: f32[1,512], index: 1, kind: output, shape index: {}]  }
   0x1   :  { %v603_v0 = vld [vmem:[%s1295_s0 + $0x1f] sm:$0x1]   ;;  %v611_v5 = vld [vmem:[%s1295_s0 + $0x1d] sm:$0x1]   ;;  %v607_v11 = vld [vmem:[%s1295_s0 + $0x1e] sm:$0x1]  }
   0x2   :  { %v604_v1 = vld [vmem:[%s1295_s0 + $0x3e] sm:$0x2]   ;;  %v612_v6 = vld [vmem:[%s1295_s0 + $0x3c] sm:$0x2]   ;;  %v608_v14 = vld [vmem:[%s1295_s0 + $0x3d] sm:$0x2]  }
   0x3   :  { %v605_v2 = vld [vmem:[%s1295_s0 + $0x5d] sm:$0x4]   ;;  %v22_v4 = vsel %vm5_vm0, %v604_v1, %v603_v0  ;;  %v613_v7 = vld [vmem:[%s1295_s0 + $0x5b] sm:$0x4]   ;;  %v58_v9 = vsel %vm5_vm0, %v612_v6, %v611_v5  ;;  %v609_v15 = vld [vmem:[%s1295_s0 + $0x5c] sm:$0x4]   ;;  %v40_v18 = vsel %vm5_vm0, %v608_v14, %v607_v11 }
   0x4   :  { %v606_v3 = vld [vmem:[%s1295_s0 + $0x7c] sm:$0x8]   ;;  %v26_v8 = vsel %vm9_vm1, %v605_v2, %v22_v4  ;;  %v614_v10 = vld [vmem:[%s1295_s0 + $0x7a] sm:$0x8]   ;;  %v62_v13 = vsel %vm9_vm1, %v613_v7, %v58_v9  ;;  %v610_v16 = vld [vmem:[%s1295_s0 + $0x7b] sm:$0x8]   ;;  %v44_v22 = vsel %vm9_vm1, %v609_v15, %v40_v18 }
   0x5   :  { %v30_v12 = vsel %vm13_vm2, %v606_v3, %v26_v8  ;;  %v66_v17 = vsel %vm13_vm2, %v614_v10, %v62_v13  ;;  %v615_v19 = vld [vmem:[%s1295_s0 + $0x1c] sm:$0x1]   ;;  %v619_v25 = vld [vmem:[%s1295_s0 + $0x1b] sm:$0x1]   ;;  %v48_v26 = vsel %vm13_vm2, %v610_v16, %v44_v22  ;;  %v623_v33 = vld [vmem:[%s1295_s0 + $0x1a] sm:$0x1]  }
   0x6   :  { %31 = vrot.lane.b32.xlu0 %v30_v12, %s761_s30  ;;  %v616_v20 = vld [vmem:[%s1295_s0 + $0x3b] sm:$0x2]   ;;  %67 = vrot.lane.b32.xlu1 %v66_v17, %s762_s8  ;;  %v620_v28 = vld [vmem:[%s1295_s0 + $0x3a] sm:$0x2]   ;;  %s763_s25 = smov 120   ;;  %s764_s30 = smov 112  }
   0x7   :  { %v617_v21 = vld [vmem:[%s1295_s0 + $0x5a] sm:$0x4]   ;;  %v76_v23 = vsel %vm5_vm0, %v616_v20, %v615_v19  ;;  %v621_v29 = vld [vmem:[%s1295_s0 + $0x59] sm:$0x4]   ;;  %v94_v32 = vsel %vm5_vm0, %v620_v28, %v619_v25  ;;  %v624_v34 = vld [vmem:[%s1295_s0 + $0x39] sm:$0x2]  }
   0x8   :  { %v618_v24 = vld [vmem:[%s1295_s0 + $0x79] sm:$0x8]   ;;  %v80_v27 = vsel %vm9_vm1, %v617_v21, %v76_v23  ;;  %v622_v30 = vld [vmem:[%s1295_s0 + $0x78] sm:$0x8]   ;;  %v625_v35 = vld [vmem:[%s1295_s0 + $0x58] sm:$0x4]   ;;  %v98_v36 = vsel %vm9_vm1, %v621_v29, %v94_v32  ;;  %v112_v37 = vsel %vm5_vm0, %v624_v34, %v623_v33 }
   0x9   :  { %v84_v31 = vsel %vm13_vm2, %v618_v24, %v80_v27  ;;  %v626_v38 = vld [vmem:[%s1295_s0 + $0x77] sm:$0x8]   ;;  %v627_v39 = vld [vmem:[%s1295_s0 + $0x19] sm:$0x1]   ;;  %v102_v40 = vsel %vm13_vm2, %v622_v30, %v98_v36  ;;  %v116_v41 = vsel %vm9_vm1, %v625_v35, %v112_v37  ;;  %v631_v47 = vld [vmem:[%s1295_s0 + $0x18] sm:$0x1]  }
   0xa   :  { %49 = vrot.lane.b32.xlu0 %v48_v26, %s763_s25  ;;  %85 = vrot.lane.b32.xlu1 %v84_v31, %s764_s30  ;;  %v628_v42 = vld [vmem:[%s1295_s0 + $0x38] sm:$0x2]   ;;  %v120_v45 = vsel %vm13_vm2, %v626_v38, %v116_v41  ;;  %v632_v48 = vld [vmem:[%s1295_s0 + $0x37] sm:$0x2]   ;;  %s765_s18 = smov 108   ;;  %s766_s23 = smov 104  }
   0xb   :  { %v629_v43 = vld [vmem:[%s1295_s0 + $0x57] sm:$0x4]   ;;  %v130_v46 = vsel %vm5_vm0, %v628_v42, %v627_v39  ;;  %v633_v49 = vld [vmem:[%s1295_s0 + $0x56] sm:$0x4]   ;;  %v148_v51 = vsel %vm5_vm0, %v632_v48, %v631_v47  ;;  %v635_v53 = vld [vmem:[%s1295_s0 + $0x17] sm:$0x1]  }
   0xc   :  { %v630_v44 = vld [vmem:[%s1295_s0 + $0x76] sm:$0x8]   ;;  %v134_v50 = vsel %vm9_vm1, %v629_v43, %v130_v46  ;;  %v634_v52 = vld [vmem:[%s1295_s0 + $0x75] sm:$0x8]   ;;  %v152_v54 = vsel %vm9_vm1, %v633_v49, %v148_v51  ;;  %v636_v55 = vld [vmem:[%s1295_s0 + $0x36] sm:$0x2]  }
   0xd   :  { %v637_v56 = vld [vmem:[%s1295_s0 + $0x55] sm:$0x4]   ;;  %v138_v57 = vsel %vm13_vm2, %v630_v44, %v134_v50  ;;  %v166_v58 = vsel %vm5_vm0, %v636_v55, %v635_v53  ;;  %v639_v59 = vld [vmem:[%s1295_s0 + $0x16] sm:$0x1]   ;;  %v156_v62 = vsel %vm13_vm2, %v634_v52, %v152_v54  ;;  %v643_v2 = vld [vmem:[%s1295_s0 + $0x15] sm:$0x1]  }
   0xe   :  { %103 = vrot.lane.b32.xlu0 %v102_v40, %s765_s18  ;;  %121 = vrot.lane.b32.xlu1 %v120_v45, %s766_s23  ;;  %v640_v60 = vld [vmem:[%s1295_s0 + $0x35] sm:$0x2]   ;;  %v170_v63 = vsel %vm9_vm1, %v637_v56, %v166_v58  ;;  %v638_v0 = vld [vmem:[%s1295_s0 + $0x74] sm:$0x8]   ;;  %s767_s11 = smov 100   ;;  %s768_s18 = smov 96  }
   0xf   :  { %v641_v61 = vld [vmem:[%s1295_s0 + $0x54] sm:$0x4]   ;;  %v184_v1 = vsel %vm5_vm0, %v640_v60, %v639_v59  ;;  %v644_v5 = vld [vmem:[%s1295_s0 + $0x34] sm:$0x2]   ;;  %v647_v8 = vld [vmem:[%s1295_s0 + $0x14] sm:$0x1]   ;;  %v174_v11 = vsel %vm13_vm2, %v638_v0, %v170_v63 }
  0x10   :  { %v188_v3 = vsel %vm9_vm1, %v641_v61, %v184_v1  ;;  %v642_v4 = vld [vmem:[%s1295_s0 + $0x73] sm:$0x8]   ;;  %v645_v6 = vld [vmem:[%s1295_s0 + $0x53] sm:$0x4]   ;;  %v202_v7 = vsel %vm5_vm0, %v644_v5, %v643_v2  ;;  %v648_v9 = vld [vmem:[%s1295_s0 + $0x33] sm:$0x2]  }
  0x11   :  { %v649_v10 = vld [vmem:[%s1295_s0 + $0x52] sm:$0x4]   ;;  %v220_v12 = vsel %vm5_vm0, %v648_v9, %v647_v8  ;;  %v651_v13 = vld [vmem:[%s1295_s0 + $0x13] sm:$0x1]   ;;  %v192_v14 = vsel %vm13_vm2, %v642_v4, %v188_v3  ;;  %v206_v15 = vsel %vm9_vm1, %v645_v6, %v202_v7  ;;  %v646_v16 = vld [vmem:[%s1295_s0 + $0x72] sm:$0x8]  }
  0x12   :  { %139 = vrot.lane.b32.xlu0 %v138_v57, %s767_s11  ;;  %157 = vrot.lane.b32.xlu1 %v156_v62, %s768_s18  ;;  %v650_v17 = vld [vmem:[%s1295_s0 + $0x71] sm:$0x8]   ;;  %v652_v18 = vld [vmem:[%s1295_s0 + $0x32] sm:$0x2]   ;;  %v224_v19 = vsel %vm9_vm1, %v649_v10, %v220_v12  ;;  %s769_s4 = smov 92   ;;  %s770_s9 = smov 88   ;;  %v210_v27 = vsel %vm13_vm2, %v646_v16, %v206_v15 }
  0x13   :  { %v238_v20 = vsel %vm5_vm0, %v652_v18, %v651_v13  ;;  %v653_v21 = vld [vmem:[%s1295_s0 + $0x51] sm:$0x4]   ;;  %v655_v22 = vld [vmem:[%s1295_s0 + $0x12] sm:$0x1]   ;;  %v659_v26 = vld [vmem:[%s1295_s0 + $0x11] sm:$0x1]   ;;  %v228_v29 = vsel %vm13_vm2, %v650_v17, %v224_v19 }
  0x14   :  { %v656_v23 = vld [vmem:[%s1295_s0 + $0x31] sm:$0x2]   ;;  %v660_v28 = vld [vmem:[%s1295_s0 + $0x30] sm:$0x2]   ;;  %v242_v30 = vsel %vm9_vm1, %v653_v21, %v238_v20  ;;  %v654_v31 = vld [vmem:[%s1295_s0 + $0x70] sm:$0x8]  }
  0x15   :  { %v256_v24 = vsel %vm5_vm0, %v656_v23, %v655_v22  ;;  %v657_v25 = vld [vmem:[%s1295_s0 + $0x50] sm:$0x4]   ;;  %v663_v32 = vld [vmem:[%s1295_s0 + $0x10] sm:$0x1]   ;;  %v274_v36 = vsel %vm5_vm0, %v660_v28, %v659_v26  ;;  %v661_v37 = vld [vmem:[%s1295_s0 + $0x4f] sm:$0x4]   ;;  %v246_v42 = vsel %vm13_vm2, %v654_v31, %v242_v30 }
  0x16   :  { %175 = vrot.lane.b32.xlu0 %v174_v11, %s769_s4  ;;  %193 = vrot.lane.b32.xlu1 %v192_v14, %s770_s9  ;;  %v664_v33 = vld [vmem:[%s1295_s0 + $0x2f] sm:$0x2]   ;;  %v260_v34 = vsel %vm9_vm1, %v657_v25, %v256_v24  ;;  %v658_v35 = vld [vmem:[%s1295_s0 + $0x6f] sm:$0x8]   ;;  %s771_s22 = smov 84   ;;  %s772_s29 = smov 80   ;;  %v278_v46 = vsel %vm9_vm1, %v661_v37, %v274_v36 }
  0x17   :  { %v292_v38 = vsel %vm5_vm0, %v664_v33, %v663_v32  ;;  %v665_v39 = vld [vmem:[%s1295_s0 + $0x4e] sm:$0x4]   ;;  %v667_v40 = vld [vmem:[%s1295_s0 + $0xf] sm:$0x1]   ;;  %v671_v43 = vld [vmem:[%s1295_s0 + $0xe] sm:$0x1]   ;;  %v264_v45 = vsel %vm13_vm2, %v658_v35, %v260_v34 }
  0x18   :  { %v668_v41 = vld [vmem:[%s1295_s0 + $0x2e] sm:$0x2]   ;;  %v672_v44 = vld [vmem:[%s1295_s0 + $0x2d] sm:$0x2]   ;;  %v662_v47 = vld [vmem:[%s1295_s0 + $0x6e] sm:$0x8]   ;;  %v296_v48 = vsel %vm9_vm1, %v665_v39, %v292_v38 }
  0x19   :  { %v666_v49 = vld [vmem:[%s1295_s0 + $0x6d] sm:$0x8]   ;;  %v310_v50 = vsel %vm5_vm0, %v668_v41, %v667_v40  ;;  %v669_v51 = vld [vmem:[%s1295_s0 + $0x4d] sm:$0x4]   ;;  %s773_s11 = smov 76   ;;  %v328_v52 = vsel %vm5_vm0, %v672_v44, %v671_v43  ;;  %s774_s18 = smov 72   ;;  %v282_v56 = vsel %vm13_vm2, %v662_v47, %v278_v46 }
  0x1a   :  { %211 = vrot.lane.b32.xlu0 %v210_v27, %s771_s22  ;;  %229 = vrot.lane.b32.xlu1 %v228_v29, %s772_s29  ;;  %v673_v53 = vld [vmem:[%s1295_s0 + $0x4c] sm:$0x4]   ;;  %v675_v54 = vld [vmem:[%s1295_s0 + $0xd] sm:$0x1]   ;;  %v300_v59 = vsel %vm13_vm2, %v666_v49, %v296_v48  ;;  %v314_v60 = vsel %vm9_vm1, %v669_v51, %v310_v50  ;;  %s775_s29 = smov 68   ;;  %s776_s7 = smov 64  }
  0x1b   :  { %v676_v55 = vld [vmem:[%s1295_s0 + $0x2c] sm:$0x2]   ;;  %v679_v57 = vld [vmem:[%s1295_s0 + $0xc] sm:$0x1]   ;;  %v670_v61 = vld [vmem:[%s1295_s0 + $0x6c] sm:$0x8]   ;;  %v332_v62 = vsel %vm9_vm1, %v673_v53, %v328_v52 }
  0x1c   :  { %v680_v58 = vld [vmem:[%s1295_s0 + $0x2b] sm:$0x2]   ;;  %v674_v63 = vld [vmem:[%s1295_s0 + $0x6b] sm:$0x8]   ;;  %v346_v0 = vsel %vm5_vm0, %v676_v55, %v675_v54  ;;  %v677_v1 = vld [vmem:[%s1295_s0 + $0x4b] sm:$0x4]   ;;  %v318_v6 = vsel %vm13_vm2, %v670_v61, %v314_v60 }
  0x1d   :  { %v364_v2 = vsel %vm5_vm0, %v680_v58, %v679_v57  ;;  %v681_v3 = vld [vmem:[%s1295_s0 + $0x4a] sm:$0x4]   ;;  %v683_v4 = vld [vmem:[%s1295_s0 + $0xb] sm:$0x1]   ;;  %v687_v7 = vld [vmem:[%s1295_s0 + $0xa] sm:$0x1]   ;;  %v336_v9 = vsel %vm13_vm2, %v674_v63, %v332_v62  ;;  %v350_v10 = vsel %vm9_vm1, %v677_v1, %v346_v0 }
  0x1e   :  { %247 = vrot.lane.b32.xlu0 %v246_v42, %s773_s11  ;;  %265 = vrot.lane.b32.xlu1 %v264_v45, %s774_s18  ;;  %v684_v5 = vld [vmem:[%s1295_s0 + $0x2a] sm:$0x2]   ;;  %v688_v8 = vld [vmem:[%s1295_s0 + $0x29] sm:$0x2]   ;;  %v368_v12 = vsel %vm9_vm1, %v681_v3, %v364_v2  ;;  %s777_s18 = smov 60   ;;  %s778_s25 = smov 56  }
  0x1f   :  { %v678_v11 = vld [vmem:[%s1295_s0 + $0x6a] sm:$0x8]   ;;  %v682_v13 = vld [vmem:[%s1295_s0 + $0x69] sm:$0x8]   ;;  %v382_v14 = vsel %vm5_vm0, %v684_v5, %v683_v4  ;;  %v685_v15 = vld [vmem:[%s1295_s0 + $0x49] sm:$0x4]   ;;  %v400_v16 = vsel %vm5_vm0, %v688_v8, %v687_v7 }
  0x20   :  { %v689_v17 = vld [vmem:[%s1295_s0 + $0x48] sm:$0x4]   ;;  %v691_v18 = vld [vmem:[%s1295_s0 + $0x9] sm:$0x1]   ;;  %v354_v20 = vsel %vm13_vm2, %v678_v11, %v350_v10  ;;  %v695_v21 = vld [vmem:[%s1295_s0 + $0x8] sm:$0x1]   ;;  %v372_v23 = vsel %vm13_vm2, %v682_v13, %v368_v12  ;;  %v386_v24 = vsel %vm9_vm1, %v685_v15, %v382_v14 }
  0x21   :  { %v692_v19 = vld [vmem:[%s1295_s0 + $0x28] sm:$0x2]   ;;  %v696_v22 = vld [vmem:[%s1295_s0 + $0x27] sm:$0x2]   ;;  %v686_v25 = vld [vmem:[%s1295_s0 + $0x68] sm:$0x8]   ;;  %v404_v26 = vsel %vm9_vm1, %v689_v17, %v400_v16 }
  0x22   :  { %283 = vrot.lane.b32.xlu0 %v282_v56, %s775_s29  ;;  %301 = vrot.lane.b32.xlu1 %v300_v59, %s776_s7  ;;  %v690_v27 = vld [vmem:[%s1295_s0 + $0x67] sm:$0x8]   ;;  %v418_v28 = vsel %vm5_vm0, %v692_v19, %v691_v18  ;;  %v693_v29 = vld [vmem:[%s1295_s0 + $0x47] sm:$0x4]   ;;  %s779_s7 = smov 52   ;;  %v436_v30 = vsel %vm5_vm0, %v696_v22, %v695_v21  ;;  %s780_s14 = smov 48   ;;  %v390_v34 = vsel %vm13_vm2, %v686_v25, %v386_v24 }
  0x23   :  { %v697_v31 = vld [vmem:[%s1295_s0 + $0x46] sm:$0x4]   ;;  %v699_v32 = vld [vmem:[%s1295_s0 + $0x7] sm:$0x1]   ;;  %v703_v35 = vld [vmem:[%s1295_s0 + $0x6] sm:$0x1]   ;;  %v408_v37 = vsel %vm13_vm2, %v690_v27, %v404_v26  ;;  %v422_v38 = vsel %vm9_vm1, %v693_v29, %v418_v28 }
  0x24   :  { %v700_v33 = vld [vmem:[%s1295_s0 + $0x26] sm:$0x2]   ;;  %v704_v36 = vld [vmem:[%s1295_s0 + $0x25] sm:$0x2]   ;;  %v694_v39 = vld [vmem:[%s1295_s0 + $0x66] sm:$0x8]   ;;  %v440_v40 = vsel %vm9_vm1, %v697_v31, %v436_v30 }
  0x25   :  { %v698_v41 = vld [vmem:[%s1295_s0 + $0x65] sm:$0x8]   ;;  %v454_v42 = vsel %vm5_vm0, %v700_v33, %v699_v32  ;;  %v701_v43 = vld [vmem:[%s1295_s0 + $0x45] sm:$0x4]   ;;  %v472_v45 = vsel %vm5_vm0, %v704_v36, %v703_v35  ;;  %v705_v46 = vld [vmem:[%s1295_s0 + $0x44] sm:$0x4]   ;;  %v426_v49 = vsel %vm13_vm2, %v694_v39, %v422_v38 }
  0x26   :  { %319 = vrot.lane.b32.xlu0 %v318_v6, %s777_s18  ;;  %337 = vrot.lane.b32.xlu1 %v336_v9, %s778_s25  ;;  %s781_s25 = smov 44   ;;  %v702_v44 = vld [vmem:[%s1295_s0 + $0x64] sm:$0x8]   ;;  %v707_v47 = vld [vmem:[%s1295_s0 + $0x5] sm:$0x1]   ;;  %s782_s5 = smov 40   ;;  %v444_v53 = vsel %vm13_vm2, %v698_v41, %v440_v40  ;;  %v458_v54 = vsel %vm9_vm1, %v701_v43, %v454_v42  ;;  %v476_v58 = vsel %vm9_vm1, %v705_v46, %v472_v45 }
  0x27   :  { %v708_v48 = vld [vmem:[%s1295_s0 + $0x24] sm:$0x2]   ;;  %v706_v50 = vld [vmem:[%s1295_s0 + $0x63] sm:$0x8]   ;;  %v711_v51 = vld [vmem:[%s1295_s0 + $0x4] sm:$0x1]   ;;  %v462_v3 = vsel %vm13_vm2, %v702_v44, %v458_v54 }
  0x28   :  { %v712_v52 = vld [vmem:[%s1295_s0 + $0x23] sm:$0x2]   ;;  %v709_v55 = vld [vmem:[%s1295_s0 + $0x43] sm:$0x4]   ;;  %v601_v57 = vld [vmem:[%s1295_s0 + $0x3e] sm:$0x4]   ;;  %v490_v59 = vsel %vm5_vm0, %v708_v48, %v707_v47  ;;  %v480_v7 = vsel %vm13_vm2, %v706_v50, %v476_v58 }
  0x29   :  { %v713_v56 = vld [vmem:[%s1295_s0 + $0x42] sm:$0x4]   ;;  %v602_v60 = vld [vmem:[%s1295_s0 + $0x5d] sm:$0x8]   ;;  %s783_s24 = smov 36   ;;  %v508_v63 = vsel %vm5_vm0, %v712_v52, %v711_v51  ;;  %s784_s29 = smov 32   ;;  %v494_v8 = vsel %vm9_vm1, %v709_v55, %v490_v59 }
  0x2a   :  { %355 = vrot.lane.b32.xlu0 %v354_v20, %s779_s7  ;;  %373 = vrot.lane.b32.xlu1 %v372_v23, %s780_s14  ;;  %v2_v61 = vld [vmem:[%s1295_s0] sm:$0x1]   ;;  %v715_v0 = vld [vmem:[%s1295_s0 + $0x3] sm:$0x1]   ;;  %v512_v11 = vsel %vm9_vm1, %v713_v56, %v508_v63  ;;  %s785_s11 = smov 28   ;;  %s786_s18 = smov 24  }
  0x2b   :  { %v600_v62 = vld [vmem:[%s1295_s0 + $0x1f] sm:$0x2]   ;;  %v716_v1 = vld [vmem:[%s1295_s0 + $0x22] sm:$0x2]   ;;  %v719_v4 = vld [vmem:[%s1295_s0 + $0x2] sm:$0x1]  }
  0x2c   :  { %v6_v2 = vsel %vm5_vm0, %v600_v62, %v2_v61  ;;  %v720_v5 = vld [vmem:[%s1295_s0 + $0x21] sm:$0x2]   ;;  %v710_v9 = vld [vmem:[%s1295_s0 + $0x62] sm:$0x8]   ;;  %v714_v12 = vld [vmem:[%s1295_s0 + $0x61] sm:$0x8]   ;;  %v526_v13 = vsel %vm5_vm0, %v716_v1, %v715_v0 }
  0x2d   :  { %v10_v6 = vsel %vm9_vm1, %v601_v57, %v6_v2  ;;  %v717_v14 = vld [vmem:[%s1295_s0 + $0x41] sm:$0x4]   ;;  %v544_v15 = vsel %vm5_vm0, %v720_v5, %v719_v4  ;;  %v721_v16 = vld [vmem:[%s1295_s0 + $0x40] sm:$0x4]   ;;  %v723_v17 = vld [vmem:[%s1295_s0 + $0x1] sm:$0x1]   ;;  %v498_v19 = vsel %vm13_vm2, %v710_v9, %v494_v8  ;;  %v516_v20 = vsel %vm13_vm2, %v714_v12, %v512_v11 }
  0x2e   :  { %391 = vrot.lane.b32.xlu0 %v390_v34, %s781_s25  ;;  %409 = vrot.lane.b32.xlu1 %v408_v37, %s782_s5  ;;  %v14_v10 = vsel %vm13_vm2, %v602_v60, %v10_v6  ;;  %v724_v18 = vld [vmem:[%s1295_s0 + $0x20] sm:$0x2]   ;;  %v530_v21 = vsel %vm9_vm1, %v717_v14, %v526_v13  ;;  %v718_v22 = vld [vmem:[%s1295_s0 + $0x60] sm:$0x8]   ;;  %v548_v23 = vsel %vm9_vm1, %v721_v16, %v544_v15  ;;  %s787_s25 = smov 20   ;;  %s788_s26 = smov 16  }
  0x2f   :  { %16 = vst.msk [vmem:[#allocation0] ss:$8 sm:$0xf] %vm15_vm3, %v14_v10   ;;  %v722_v24 = vld [vmem:[%s1295_s0 + $0x5f] sm:$0x8]   ;;  %v562_v25 = vsel %vm5_vm0, %v724_v18, %v723_v17  ;;  %v534_v27 = vsel %vm13_vm2, %v718_v22, %v530_v21  ;;  %s791_s30 = smov 4  }
  0x30   :  { %v725_v26 = vld [vmem:[%s1295_s0 + $0x3f] sm:$0x4]   ;;  %v552_v28 = vsel %vm13_vm2, %v722_v24, %v548_v23  ;;  %vm33_vm4 = vcmask 1048544   ;;  %vm51_vm5 = vcmask 1015744   ;;  %vm69_vm6 = vcmask 982944  }
  0x31   :  { %v566_v29 = vsel %vm9_vm1, %v725_v26, %v562_v25  ;;  %v726_v30 = vld [vmem:[%s1295_s0 + $0x5e] sm:$0x8]   ;;  %s789_s0 = smov 12   ;;  %vm87_vm7 = vcmask 950144   ;;  %vm105_vm8 = vcmask 917344   ;;  %vm123_vm9 = vcmask 884544  }
  0x32   :  { %427 = vrot.lane.b32.xlu0 %v426_v49, %s783_s24  ;;  %445 = vrot.lane.b32.xlu1 %v444_v53, %s784_s29  ;;  %s790_s29 = smov 8   ;;  %v570_v31 = vsel %vm13_vm2, %v726_v30, %v566_v29  ;;  %vm141_vm10 = vcmask 851744   ;;  %vm159_vm11 = vcmask 818944   ;;  %vm177_vm12 = vcmask 786144  }
  0x33   :  { %vm195_vm13 = vcmask 753344   ;;  %vm213_vm14 = vcmask 720544   ;;  %vm231_vm15 = vcmask 687744   ;;  %vm249_vm0 = vcmask 654944  }
  0x34   :  { %vm267_vm1 = vcmask 622144   ;;  %vm285_vm2 = vcmask 589344   ;;  %vm303_vm3 = vcmask 556544  }
  0x36   :  { %463 = vrot.lane.b32.xlu0 %v462_v3, %s785_s11  ;;  %481 = vrot.lane.b32.xlu1 %v480_v7, %s786_s18 }
  0x3a   :  { %499 = vrot.lane.b32.xlu0 %v498_v19, %s787_s25  ;;  %517 = vrot.lane.b32.xlu1 %v516_v20, %s788_s26 }
  0x3e   :  { %535 = vrot.lane.b32.xlu0 %v534_v27, %s789_s0  ;;  %553 = vrot.lane.b32.xlu1 %v552_v28, %s790_s29 }
  0x42   :  { %571 = vrot.lane.b32.xlu0 %v570_v31, %s791_s30 }
  0x78   :  { %v32_v32 = vpop.permute.xlu0 %31   ;;  %v68_v33 = vpop.permute.xlu1 %67  }
  0x79   :  { %34 = vst.msk [vmem:[#allocation0] ss:$8 sm:$0xf] %vm33_vm4, %v32_v32   ;;  %vm321_vm4 = vcmask 523744  }
  0x7c   :  { %v50_v34 = vpop.permute.xlu0 %49   ;;  %v86_v35 = vpop.permute.xlu1 %85  }
  0x7d   :  { %52 = vst.msk [vmem:[#allocation0] ss:$8 sm:$0xf] %vm51_vm5, %v50_v34   ;;  %vm339_vm5 = vcmask 490944  }
  0x7e   :  { %70 = vst.msk [vmem:[#allocation0] ss:$8 sm:$0xf] %vm69_vm6, %v68_v33   ;;  %vm357_vm6 = vcmask 458144  }
  0x7f   :  { %88 = vst.msk [vmem:[#allocation0] ss:$8 sm:$0xf] %vm87_vm7, %v86_v35   ;;  %vm375_vm7 = vcmask 425344  }
  0x80   :  { %v104_v36 = vpop.permute.xlu0 %103   ;;  %v122_v37 = vpop.permute.xlu1 %121  }
  0x81   :  { %106 = vst.msk [vmem:[#allocation0] ss:$8 sm:$0xf] %vm105_vm8, %v104_v36   ;;  %vm393_vm8 = vcmask 392544  }
  0x82   :  { %124 = vst.msk [vmem:[#allocation0] ss:$8 sm:$0xf] %vm123_vm9, %v122_v37   ;;  %vm411_vm9 = vcmask 359744  }
  0x84   :  { %v140_v38 = vpop.permute.xlu0 %139   ;;  %v158_v39 = vpop.permute.xlu1 %157  }
  0x85   :  { %142 = vst.msk [vmem:[#allocation0] ss:$8 sm:$0xf] %vm141_vm10, %v140_v38   ;;  %vm429_vm10 = vcmask 326944  }
  0x86   :  { %160 = vst.msk [vmem:[#allocation0] ss:$8 sm:$0xf] %vm159_vm11, %v158_v39   ;;  %vm447_vm11 = vcmask 294144  }
  0x88   :  { %v176_v40 = vpop.permute.xlu0 %175   ;;  %v194_v41 = vpop.permute.xlu1 %193  }
  0x89   :  { %178 = vst.msk [vmem:[#allocation0] ss:$8 sm:$0xf] %vm177_vm12, %v176_v40   ;;  %vm465_vm12 = vcmask 261344  }
  0x8a   :  { %196 = vst.msk [vmem:[#allocation0] ss:$8 sm:$0xf] %vm195_vm13, %v194_v41   ;;  %vm483_vm13 = vcmask 228544  }
  0x8c   :  { %v212_v42 = vpop.permute.xlu0 %211   ;;  %v230_v43 = vpop.permute.xlu1 %229  }
  0x8d   :  { %214 = vst.msk [vmem:[#allocation0] ss:$8 sm:$0xf] %vm213_vm14, %v212_v42   ;;  %vm501_vm14 = vcmask 195744  }
  0x8e   :  { %232 = vst.msk [vmem:[#allocation0] ss:$8 sm:$0xf] %vm231_vm15, %v230_v43   ;;  %vm519_vm15 = vcmask 162944  }
  0x90   :  { %v248_v44 = vpop.permute.xlu0 %247   ;;  %v266_v45 = vpop.permute.xlu1 %265  }
  0x91   :  { %250 = vst.msk [vmem:[#allocation0] ss:$8 sm:$0xf] %vm249_vm0, %v248_v44   ;;  %vm537_vm0 = vcmask 130144  }
  0x92   :  { %268 = vst.msk [vmem:[#allocation0] ss:$8 sm:$0xf] %vm267_vm1, %v266_v45   ;;  %vm555_vm1 = vcmask 97344  }
  0x94   :  { %v284_v46 = vpop.permute.xlu0 %283   ;;  %v302_v47 = vpop.permute.xlu1 %301  }
  0x95   :  { %286 = vst.msk [vmem:[#allocation0] ss:$8 sm:$0xf] %vm285_vm2, %v284_v46   ;;  %vm573_vm2 = vcmask 64544  }
  0x96   :  { %304 = vst.msk [vmem:[#allocation0] ss:$8 sm:$0xf] %vm303_vm3, %v302_v47  }
  0x98   :  { %v320_v48 = vpop.permute.xlu0 %319   ;;  %v338_v49 = vpop.permute.xlu1 %337  }
  0x99   :  { %322 = vst.msk [vmem:[#allocation0] ss:$8 sm:$0xf] %vm321_vm4, %v320_v48  }
  0x9a   :  { %340 = vst.msk [vmem:[#allocation0] ss:$8 sm:$0xf] %vm339_vm5, %v338_v49  }
  0x9c   :  { %v356_v50 = vpop.permute.xlu0 %355   ;;  %v374_v51 = vpop.permute.xlu1 %373  }
  0x9d   :  { %358 = vst.msk [vmem:[#allocation0] ss:$8 sm:$0xf] %vm357_vm6, %v356_v50  }
  0x9e   :  { %376 = vst.msk [vmem:[#allocation0] ss:$8 sm:$0xf] %vm375_vm7, %v374_v51  }
  0xa0   :  { %v392_v52 = vpop.permute.xlu0 %391   ;;  %v410_v53 = vpop.permute.xlu1 %409  }
  0xa1   :  { %394 = vst.msk [vmem:[#allocation0] ss:$8 sm:$0xf] %vm393_vm8, %v392_v52  }
  0xa2   :  { %412 = vst.msk [vmem:[#allocation0] ss:$8 sm:$0xf] %vm411_vm9, %v410_v53  }
  0xa4   :  { %v428_v54 = vpop.permute.xlu0 %427   ;;  %v446_v55 = vpop.permute.xlu1 %445  }
  0xa5   :  { %430 = vst.msk [vmem:[#allocation0] ss:$8 sm:$0xf] %vm429_vm10, %v428_v54  }
  0xa6   :  { %448 = vst.msk [vmem:[#allocation0] ss:$8 sm:$0xf] %vm447_vm11, %v446_v55  }
  0xa8   :  { %v464_v56 = vpop.permute.xlu0 %463   ;;  %v482_v57 = vpop.permute.xlu1 %481  }
  0xa9   :  { %466 = vst.msk [vmem:[#allocation0] ss:$8 sm:$0xf] %vm465_vm12, %v464_v56  }
  0xaa   :  { %484 = vst.msk [vmem:[#allocation0] ss:$8 sm:$0xf] %vm483_vm13, %v482_v57  }
  0xac   :  { %v500_v58 = vpop.permute.xlu0 %499   ;;  %v518_v59 = vpop.permute.xlu1 %517  }
  0xad   :  { %502 = vst.msk [vmem:[#allocation0] ss:$8 sm:$0xf] %vm501_vm14, %v500_v58  }
  0xae   :  { %520 = vst.msk [vmem:[#allocation0] ss:$8 sm:$0xf] %vm519_vm15, %v518_v59  }
  0xb0   :  { %v536_v60 = vpop.permute.xlu0 %535   ;;  %v554_v61 = vpop.permute.xlu1 %553  }
  0xb1   :  { %538 = vst.msk [vmem:[#allocation0] ss:$8 sm:$0xf] %vm537_vm0, %v536_v60  }
  0xb2   :  { %556 = vst.msk [vmem:[#allocation0] ss:$8 sm:$0xf] %vm555_vm1, %v554_v61  }
  0xb4   :  { %v572_v62 = vpop.permute.xlu0 %571  }
  0xb5   :  { %574 = vst.msk [vmem:[#allocation0] ss:$8 sm:$0xf] %vm573_vm2, %v572_v62  }
  0xbc   :  { %v578_v63 = vld [vmem:[#allocation0] sm:$0x1]  ;;  %v582_v0 = vld [vmem:[#allocation0 + $0x8] sm:$0x1]  ;;  %v587_v1 = vld [vmem:[#allocation0 + $0x10] sm:$0x1] }
  0xbd   :  { %580 = vst [vmem:[%s1296_s1] sm:$0x1] %v578_v63  ;;  %727 = vst [vmem:[%s1296_s1 + $0x1] sm:$0x1] %v582_v0  ;;  %v593_v2 = vld [vmem:[#allocation0 + $0x18] sm:$0x1] }
  0xbe   :  { %728 = vst [vmem:[%s1296_s1 + $0x2] sm:$0x1] %v587_v1  ;;  %729 = vst [vmem:[%s1296_s1 + $0x3] sm:$0x1] %v593_v2 }

// kernel: pointcloud_scaling.1
= control target key start
LH: loop header
LB: loop body
LE: loop exit
PB: predicated region body
PF: predicated region fallthrough
CT: control target
= control target key end

     0   :  { %v14_v0 = vlaneseq  ;;  %v55_v1 = vmov 1983009808   ;;  %s80_s0 = inlined_call_operand.vmem [shape: f32[1,512], index: 0, kind: input, shape index: {}]   ;;  %s81_s1 = inlined_call_operand.vmem [shape: f32[2,512], index: 1, kind: input, shape index: {}, may-alias: {1,2}]   ;;  %s82_s2 = inlined_call_operand.vmem [shape: f32[2,512], index: 2, kind: output, shape index: {}, may-alias: {1,2}]  }
   0x1   :  { %v33_v2 = vunpack.c.l.s4 %v55_v1  ;;  %v12_v4 = vld [vmem:[%s80_s0] sm:$0xf] }
   0x2   :  { %v15_v3 = vshrl.u32 %v14_v0, 7  ;;  %v11_v19 = vld [vmem:[%s81_s1] sm:$0xff] }
   0x3   :  { %v34_v5 = vunpack.c.0.s8 %v33_v2 }
   0x4   :  { %v16_v6 = vsub.s32 0, %v15_v3  ;;  %v20_v7 = vsub.s32 1, %v15_v3  ;;  %v24_v8 = vsub.s32 2, %v15_v3  ;;  %v28_v9 = vsub.s32 3, %v15_v3 }
   0x5   :  { %v37_v10 = vsub.s32 %v34_v5, %v15_v3 }
   0x6   :  { %v17_v11 = vrot.slane %v12_v4, %v16_v6  ;;  %v21_v12 = vrot.slane %v12_v4, %v20_v7  ;;  %v25_v13 = vrot.slane %v12_v4, %v24_v8  ;;  %v29_v14 = vrot.slane %v12_v4, %v28_v9 }
   0x8   :  { %v30_v15 = vcombine.low %v17_v11, %v21_v12  ;;  %v31_v16 = vcombine.low %v25_v13, %v29_v14 }
   0xa   :  { %v38_v17 = vrot.slane %v30_v15, %v37_v10  ;;  %v45_v18 = vrot.slane %v31_v16, %v37_v10 }
   0xc   :  { %v46_v20 = vcombine.low %v38_v17, %v45_v18 }
   0xe   :  { %v48_v21 = vmul.f32 %v46_v20, %v11_v19 }
  0x10   :  { %49 = vst [vmem:[%s82_s2] sm:$0xff] %v48_v21 }

</bundles_post_ra>
